<compile_context>
chip_gen: v7x
topology: tpu7x:2x2x1
jax: 0.10.0
libtpu: 0.0.40
codegen_flags: <defaults>
</compile_context>

<pallas_src>
import jax
import jax.numpy as jnp
from jax import lax
from jax.experimental import pallas as pl
from jax.experimental.pallas import tpu as pltpu


# ------------------------------------------------------------------ helpers

_TARGET_X_BLOCK_BYTES = 4 << 20   # ~4 MiB of x per DMA step (>=85% HBM roofline)
_MAX_TILE_M = 32768


def _ceil_to(x, m):
    return -(-x // m) * m


def _vmem_capacity_bytes():
    """Physical VMEM of the local TPU; conservative 64 MiB (v7x) fallback."""
    try:
        info = pltpu.get_tpu_info()
        cap = getattr(info, "vmem_capacity_bytes", None)
        if cap:
            return int(cap)
    except Exception:
        pass
    return 64 << 20


def _pick_tile_m(B, in_features, out_features, x_bytes, out_bytes, vmem_cap):
    """Rows of x per grid step, derived from a VMEM byte budget."""
    if B <= 128:
        return B                                   # single block
    row_in_hbm = in_features * x_bytes             # actual HBM bytes per row
    row_in_vmem = _ceil_to(in_features, 128) * x_bytes       # lane-padded
    row_out_vmem = _ceil_to(out_features, 8) * out_bytes      # sublane-padded
    # Generation-aware budget for the double-buffered pipeline
    # (~29 MiB on v7x's 64 MiB VMEM, ~58 MiB on v5e/v6e's 128 MiB).
    budget = max(int(vmem_cap * 0.45), 8 << 20)
    tile_m = _TARGET_X_BLOCK_BYTES // row_in_hbm
    tile_m = min(tile_m, budget // (2 * (row_in_vmem + row_out_vmem)))
    tile_m = min(tile_m, _MAX_TILE_M, B)
    return max(128, (tile_m // 128) * 128)


# ------------------------------------------------------------------ kernels

def _affine_t(x_ref, w_ref, b_ref):
    # x_ref: [tile_m, in]   (one batch tile, caller dtype)
    # w_ref: [out, in]      (native PyTorch layout)
    # b_ref: [out, 1]       (f32)
    # MXU: lhs = x (canonical, contract last dim), rhs = W contracted on its
    # last dim (x @ W^T).  Only the tiny [tile_m, out] result is transposed
    # for the lane-dense [out, tile_m] store (review #6).
    zb = lax.dot_general(
        x_ref[...], w_ref[...],
        dimension_numbers=(((1,), (1,)), ((), ())),
        preferred_element_type=jnp.float32)            # [tile_m, out]
    return zb.T + b_ref[...]                           # [out, tile_m]


def _sigmoid_kernel(x_ref, w_ref, b_ref, o_ref):
    z = _affine_t(x_ref, w_ref, b_ref)
    # Stable sigmoid, exact divide: exp(-|z|) never overflows.
    ez = jnp.exp(-jnp.abs(z))
    sig = jnp.where(z >= 0.0, 1.0, ez) / (1.0 + ez)
    o_ref[...] = sig.astype(o_ref.dtype)


def _predict_kernel(x_ref, w_ref, b_ref, o_ref):
    # sigmoid(z) >= 0.5  <=>  z >= 0 : fused threshold, no exp / divide.
    z = _affine_t(x_ref, w_ref, b_ref)
    o_ref[...] = (z >= 0.0).astype(o_ref.dtype)


# ------------------------------------------------------------------ wrappers

def _run(kernel, x, weight, bias, out_dtype, *, tile_m=None, transcendental=False):
    """x: [B, in] (f32 or bf16), weight: [out, in] (PyTorch layout), bias: [out]."""
    B, in_features = x.shape
    out_features, in_features_w = weight.shape
    assert in_features == in_features_w

    # Never cast the big activation per call (review #5) — to get the bf16
    # benefit the caller passes bf16 x.  Only the tiny params are harmonized.
    if weight.dtype != x.dtype:
        weight = weight.astype(x.dtype)
    bias2d = bias.reshape(out_features, 1).astype(jnp.float32)

    x_bytes = x.dtype.itemsize
    out_bytes = jnp.dtype(out_dtype).itemsize
    vmem_cap = _vmem_capacity_bytes()

    if tile_m is None:
        tile_m = _pick_tile_m(B, in_features, out_features, x_bytes, out_bytes,
                              vmem_cap)
    if B <= tile_m:
        tile_m = B                                  # single block == full batch
    else:
        tile_m = max(128, (tile_m // 128) * 128)    # lane-dense output tiles
    grid = (pl.cdiv(B, tile_m),)

    # VMEM footprint (lane/sublane padded, double-buffered) -> vmem_limit_bytes
    x_blk = tile_m * _ceil_to(in_features, 128) * x_bytes
    o_blk = _ceil_to(out_features, 8) * _ceil_to(tile_m, 128) * out_bytes
    w_blk = _ceil_to(out_features, 8) * _ceil_to(in_features, 128) * x_bytes
    b_blk = _ceil_to(out_features, 8) * 128 * 4
    footprint = 2 * (x_blk + o_blk + w_blk + b_blk) + (2 << 20)
    vmem_limit = int(min(max(footprint, 16 << 20), int(vmem_cap * 0.9)))

    cost = pl.CostEstimate(
        flops=2 * B * in_features * out_features,
        transcendentals=(B * out_features) if transcendental else 0,
        bytes_accessed=(B * in_features * x_bytes
                        + out_features * in_features * x_bytes
                        + out_features * 4
                        + B * out_features * out_bytes))

    out_t = pl.pallas_call(
        kernel,
        out_shape=jax.ShapeDtypeStruct((out_features, B), out_dtype),
        grid=grid,
        in_specs=[
            pl.BlockSpec((tile_m, in_features), lambda i: (i, 0)),
            pl.BlockSpec((out_features, in_features), lambda i: (0, 0)),
            pl.BlockSpec((out_features, 1), lambda i: (0, 0)),
        ],
        out_specs=pl.BlockSpec((out_features, tile_m), lambda i: (0, i)),
        compiler_params=pltpu.CompilerParams(
            dimension_semantics=("parallel",),
            vmem_limit_bytes=vmem_limit),
        cost_estimate=cost,
    )(x, weight, bias2d)

    # Layout plumbing back to the PyTorch [batch, out] convention (the
    # [out, B] slab is 1/8 the size of the x read for these shapes).
    return out_t.T


def forward(x, weight, bias, *, tile_m=None):
    """Model.forward: sigmoid(x @ W^T + b) -> [B, out] float32."""
    return _run(_sigmoid_kernel, x, weight, bias, jnp.float32,
                tile_m=tile_m, transcendental=True)


def predict(x, weight, bias, *, tile_m=None):
    """Model.predict with the 0.5 threshold fused into the kernel (z >= 0)."""
    return _run(_predict_kernel, x, weight, bias, jnp.int32,
                tile_m=tile_m, transcendental=False)


# ------------------------------------------------------------------ self-test

if __name__ == "__main__":
    key = jax.random.PRNGKey(0)
    k_x, k_w, k_b, k_x2 = jax.random.split(key, 4)

    input_size, output_size = 32, 4
    bound = 1.0 / (input_size ** 0.5)

    def bf16_representable(a):
        # Round to bf16-representable f32 so the check is insensitive to the
        # backend's f32-matmul operand rounding (DEFAULT TPU precision).
        return a.astype(jnp.bfloat16).astype(jnp.float32)

    weight = bf16_representable(jax.random.uniform(
        k_w, (output_size, input_size), minval=-bound, maxval=bound,
        dtype=jnp.float32))
    bias = bf16_representable(jax.random.uniform(
        k_b, (output_size,), minval=-bound, maxval=bound, dtype=jnp.float32))

    # Small shape (single block, batch == 8).
    x_small = bf16_representable(
        jax.random.normal(k_x, (8, input_size), dtype=jnp.float32))
    out_small = jax.block_until_ready(forward(x_small, weight, bias))
    ref_small = jax.nn.sigmoid(x_small @ weight.T + bias)
    assert out_small.shape == (8, output_size)
    assert jnp.allclose(out_small, ref_small, atol=2e-3, rtol=2e-3)

    # Larger batch with an explicit small tile -> 4-step pipelined grid.
    x_big = bf16_representable(
        jax.random.normal(k_x2, (512, input_size), dtype=jnp.float32))
    ref_big = jax.nn.sigmoid(x_big @ weight.T + bias)
    out_big = jax.block_until_ready(forward(x_big, weight, bias, tile_m=128))
    assert out_big.shape == (512, output_size)
    assert jnp.allclose(out_big, ref_big, atol=2e-3, rtol=2e-3)

    # Auto-derived (VMEM-budget) tiling path.
    out_auto = jax.block_until_ready(forward(x_big, weight, bias))
    assert jnp.allclose(out_auto, ref_big, atol=2e-3, rtol=2e-3)

    # bf16 activation path: caller supplies bf16 x (no per-call cast of x
    # inside the wrapper); f32 accumulation + f32 epilogue.
    out_bf16 = jax.block_until_ready(
        forward(x_big.astype(jnp.bfloat16), weight, bias))
    assert jnp.allclose(out_bf16, ref_big, atol=2e-2, rtol=2e-2)

    # Fused-threshold predict; ignore ties where |z| is at rounding noise.
    pred = jax.block_until_ready(predict(x_big, weight, bias, tile_m=128))
    ref_z = x_big @ weight.T + bias
    ref_pred = (ref_z >= 0.0).astype(jnp.int32)
    decisive = jnp.abs(ref_z) > 1e-3
    assert pred.shape == (512, output_size)
    assert bool(jnp.all((pred == ref_pred) | ~decisive))

    print("KERNEL_OK")
</pallas_src>

<mosaic_0001>
module attributes {stable_mosaic.version = 11 : i64} {
  func.func @_sigmoid_kernel(%arg0: i32, %arg1: memref<8x32xf32, #tpu.memory_space<vmem>>, %arg2: memref<4x32xf32, #tpu.memory_space<vmem>>, %arg3: memref<4x1xf32, #tpu.memory_space<vmem>>, %arg4: memref<4x8xf32, #tpu.memory_space<vmem>>) attributes {dimension_semantics = [#tpu.dimension_semantics<parallel>], iteration_bounds = array<i64: 1>, scalar_prefetch = 0 : i64, scratch_operands = 0 : i64, tpu.core_type = #tpu.core_type<tc>, window_params = [{transform_indices = @transform_0, window_bounds = array<i64: 8, 32>}, {pipeline_mode = #tpu.pipeline_mode<synchronous>, transform_indices = @transform_1, window_bounds = array<i64: 4, 32>}, {pipeline_mode = #tpu.pipeline_mode<synchronous>, transform_indices = @transform_2, window_bounds = array<i64: 4, 1>}, {transform_indices = @transform_3, window_bounds = array<i64: 4, 8>}]} {
    %c0 = arith.constant 0 : index
    %c0_0 = arith.constant 0 : index
    %0 = vector.load %arg1[%c0, %c0_0] : memref<8x32xf32, #tpu.memory_space<vmem>>, vector<8x32xf32>
    %c0_1 = arith.constant 0 : index
    %c0_2 = arith.constant 0 : index
    %1 = vector.load %arg2[%c0_1, %c0_2] : memref<4x32xf32, #tpu.memory_space<vmem>>, vector<4x32xf32>
    %cst = arith.constant dense<0.000000e+00> : vector<8x4xf32>
    %2 = tpu.matmul %0, %1, %cst {dimension_numbers = #tpu.dot_dimension_numbers<[1], [1], [0], [0], [0, 0, 1, 0], [], []>} : vector<8x32xf32>, vector<4x32xf32>, vector<8x4xf32> -> vector<8x4xf32>
    %3 = tpu.transpose %2, [1, 0] : vector<8x4xf32> -> vector<4x8xf32>
    %c0_3 = arith.constant 0 : index
    %c0_4 = arith.constant 0 : index
    %4 = vector.load %arg3[%c0_3, %c0_4] : memref<4x1xf32, #tpu.memory_space<vmem>>, vector<4x1xf32>
    %5 = vector.broadcast %4 : vector<4x1xf32> to vector<4x8xf32>
    %6 = arith.addf %3, %5 : vector<4x8xf32>
    %7 = math.absf %6 : vector<4x8xf32>
    %cst_5 = arith.constant 0.000000e+00 : f32
    %8 = vector.broadcast %cst_5 : f32 to vector<4x8xf32>
    %9 = arith.subf %8, %7 : vector<4x8xf32>
    %10 = math.exp %9 : vector<4x8xf32>
    %cst_6 = arith.constant 0.000000e+00 : f32
    %11 = vector.broadcast %cst_6 : f32 to vector<4x8xf32>
    %12 = arith.cmpf oge, %6, %11 : vector<4x8xf32>
    %cst_7 = arith.constant 1.000000e+00 : f32
    %13 = vector.broadcast %cst_7 : f32 to vector<4x8xf32>
    %14 = arith.select %12, %13, %10 : vector<4x8xi1>, vector<4x8xf32>
    %cst_8 = arith.constant 1.000000e+00 : f32
    %15 = vector.broadcast %cst_8 : f32 to vector<4x8xf32>
    %16 = arith.addf %15, %10 : vector<4x8xf32>
    %17 = arith.divf %14, %16 : vector<4x8xf32>
    %c0_9 = arith.constant 0 : index
    %c0_10 = arith.constant 0 : index
    %18 = vector.load %arg4[%c0_9, %c0_10] : memref<4x8xf32, #tpu.memory_space<vmem>>, vector<4x8xf32>
    tpu.vector_store %arg4[%c0_9, %c0_10], %17 {strides = array<i32>} : memref<4x8xf32, #tpu.memory_space<vmem>>, vector<4x8xf32>,
    return
  }
  func.func @transform_0(%arg0: i32) -> (i32, i32) {
    %c0_i32 = arith.constant 0 : i32
    %c0_i32_0 = arith.constant 0 : i32
    return %arg0, %c0_i32 : i32, i32
  }
  func.func @transform_1(%arg0: i32) -> (i32, i32) {
    %c0_i32 = arith.constant 0 : i32
    %c0_i32_0 = arith.constant 0 : i32
    %c0_i32_1 = arith.constant 0 : i32
    return %c0_i32, %c0_i32_0 : i32, i32
  }
  func.func @transform_2(%arg0: i32) -> (i32, i32) {
    %c0_i32 = arith.constant 0 : i32
    %c0_i32_0 = arith.constant 0 : i32
    %c0_i32_1 = arith.constant 0 : i32
    return %c0_i32, %c0_i32_0 : i32, i32
  }
  func.func @transform_3(%arg0: i32) -> (i32, i32) {
    %c0_i32 = arith.constant 0 : i32
    %c0_i32_0 = arith.constant 0 : i32
    return %c0_i32, %arg0 : i32, i32
  }
}

</mosaic_0001>

<bundles_post_ra>
// kernel: tpu_custom_call.1
= control target key start
LH: loop header
LB: loop body
LE: loop exit
PB: predicated region body
PF: predicated region fallthrough
CT: control target
= control target key end

     0   :  { %8 = vsyncpa [#allocation3], 0  ;;  %s293_s0 = inlined_call_operand.hbm [shape: f32[8,32], index: 0, kind: input, shape index: {}]   ;;  %s294_s1 = inlined_call_operand.vmem [shape: f32[4,32], index: 1, kind: input, shape index: {}]   ;;  %s295_s2 = inlined_call_operand.vmem [shape: f32[4,1], index: 2, kind: input, shape index: {}]   ;;  %s296_s3 = inlined_call_operand.hbm [shape: f32[4,8], index: 3, kind: output, shape index: {}]  }
   0x1   :  { %9 = vsyncpa [#allocation4], 0  ;;  %s238_s12 = smov [#allocation2]   ;;  %s190_s16 = scalar_lea.hbm %s293_s0, 128 }
   0x2   :  { %s16_s13 = sshll.u32 %s238_s12, 4  ;;  %p191_p0 = scmp.ne.s32.totalorder %s293_s0, %s190_s16  ;;  %s17_s13 = int_to_ptr.vmem [resolvable:$true] %s16_s13 }
   0x3   :  { %p194_p1 = scmp.lt.u32.totalorder %s190_s16, %s293_s0 }
   0x5   :  { %p196_p2 = pnand %p194_p1, %p191_p0 }
   0x7   :  { %199 = shalt.err (!%p196_p2)
}
   0x8   :  { %s200_s21 = scalar_lea.vmem %s17_s13, 128  ;;  %p205_p4 = scmp.lt.s32.totalorder %s17_s13, %s17_s13 }
   0x9   :  { %p201_p3 = scmp.ne.s32.totalorder %s17_s13, %s200_s21  ;;  %p206_p5 = scmp.lt.s32.totalorder %s200_s21, %s200_s21 }
   0xb   :  { %p207_p6 = por %p206_p5, %p205_p4 }
   0xd   :  { %p208_p7 = pnand %p207_p6, %p201_p3 }
   0xf   :  { %211 = shalt.err (!%p208_p7)
}
  0x10   :  { %19 = dma.hbm_to_vmem [thread:$0]  %s293_s0, 128, %s17_s13, [#allocation3]  }
  0x11   :  { %234 = dma.done.wait [#allocation3], 128  }
  0x12   :  { %235 = vsyncadd [#allocation3], 4294967168  ;;  %v239_v0 = vmov 0.0   ;;  %vm240_vm0 = vmmov 0   ;;  %v241_v1 = vmov 0   ;;  %vm29_vm1 = vcmask 261120  }
  0x13   :  { %175 = vmatprep.subr.mxu0 %v239_v0  ;;  %177 = vmatprep.mubr.msk.f32.mxu0 %vm240_vm0, %v239_v0  ;;  %v28_v2 = vld [vmem:[%s294_s1] sm:$0xf]  ;;  %s242_s0 = smov [#allocation5]   ;;  %vm154_vm3 = vcmask 60416  }
  0x14   :  { %185 = vset.pattern.permute.xlu0 %v241_v1  ;;  %v138_v3 = vld [vmem:[%s295_s2] sm:$0xf]  ;;  %176 = vmatpush3.xpose.msk.msra.mxu0 %vm29_vm1, %v28_v2  ;;  %s162_s1 = sshll.u32 %s242_s0, 4  ;;  %s163_s1 = int_to_ptr.vmem [resolvable:$true] %s162_s1 }
  0x15   :  { %v27_v4 = vld [vmem:[#allocation2] sm:$0xff]  ;;  %141 = vperm.xlu0 %185, %v138_v3   ;;  %s212_s2 = scalar_lea.vmem %s163_s1, 64  ;;  %p217_p9 = scmp.lt.s32.totalorder %s163_s1, %s163_s1 }
  0x16   :  { %p213_p8 = scmp.ne.s32.totalorder %s163_s1, %s212_s2  ;;  %p218_p10 = scmp.lt.s32.totalorder %s212_s2, %s212_s2 }
  0x17   :  { %178 = vmatmul.mubr.msk.f32.vlgmr.msra.gmra.mrb[0].mxu0 %vm29_vm1, %v27_v4 }
  0x18   :  { %p219_p11 = por %p218_p10, %p217_p9 }
  0x1a   :  { %p220_p12 = pnand %p219_p11, %p213_p8 }
  0x94   :  { %v142_v7 = vpop.permute.xlu0 %141 }
  0xea   :  { %v102_v5 = vpop.f32.mrb[0].mxu0 }
  0xeb   :  { %106 = vxpose.xlu0.b32.start.end [1/1] (short) (narrow) %v102_v5, 8  ;;  %v179_v6 = vpop.f32.mrb[1].mxu0 }
 0x16b   :  { %v122_v8 = vpop.trf.xlu0 }
 0x16c   :  { %v144_v9 = vadd.f32 %v142_v7, %v122_v8 }
 0x16e   :  { %v145_v10 = vand.u32 2147483647, %v144_v9  ;;  %vm149_vm2 = vcmp.ge.f32.partialorder %v144_v9, 0.0 }
 0x170   :  { %v146_v11 = vsub.f32 0.0, %v145_v10 }
 0x172   :  { %v147_v12 = vmul.f32 1.442695, %v146_v11 }
 0x174   :  { %186 = vpow2.f32 %v147_v12 }
 0x17e   :  { %v187_v13 = vpop.eup %186 }
 0x17f   :  { %v151_v14 = vadd.f32 1.0, %v187_v13  ;;  %v150_v16 = vsel %vm149_vm2, 1.0, %v187_v13 }
 0x181   :  { %188 = vrcp.f32 %v151_v14 }
 0x18b   :  { %v189_v15 = vpop.eup %188 }
 0x18c   :  { %v153_v17 = vmul.f32 %v189_v15, %v150_v16 }
 0x18e   :  { %155 = vst.msk [vmem:[#allocation5] sm:$0xf] %vm154_vm3, %v153_v17 }
 0x18f   :  { %223 = shalt.err (!%p220_p12)
}
 0x190   :  { %s224_s30 = scalar_lea.hbm %s296_s3, 64 }
 0x191   :  { %p225_p13 = scmp.ne.s32.totalorder %s296_s3, %s224_s30  ;;  %p228_p0 = scmp.lt.u32.totalorder %s224_s30, %s296_s3 }
 0x193   :  { %p230_p1 = pnand %p228_p0, %p225_p13 }
 0x195   :  { %233 = shalt.err (!%p230_p1)
}
 0x196   :  { %165 = dma.vmem_to_hbm [thread:$0]  %s163_s1, 64, %s296_s3, [#allocation4]  }
 0x197   :  { %236 = dma.done.wait [#allocation4], 64  }
 0x198   :  { %237 = vsyncadd [#allocation4], 4294967232 }
 0x199   :  { %169 = vsyncpa [#allocation3], 1 }
 0x19a   :  { %170 = vsyncpa [#allocation4], 1 }

</bundles_post_ra>
